<compile_context>
chip_gen: v5e
topology: v5e:2x2
jax: 0.10.0
libtpu: 0.0.40
codegen_flags: <defaults>
</compile_context>

<pallas_src>
import functools

import jax
import jax.numpy as jnp
from jax import lax
from jax.experimental import pallas as pl
from jax.experimental.pallas import tpu as pltpu

EPS = 1e-5
LANE = 128
MATMUL_DTYPE = jnp.bfloat16            # MXU input dtype (accumulation stays f32)


def _round_up(x, m):
    return (x + m - 1) // m * m


def _vmem_limit_bytes():
    """Generation-aware scoped-VMEM budget (~96 MiB v5e/v6e, ~48 MiB v7x)."""
    cap = 64 * 1024 * 1024
    try:
        info = pltpu.get_tpu_info()
        cap = int(getattr(info, "vmem_capacity_bytes", cap))
    except Exception:
        pass
    return max(32 * 1024 * 1024, min(cap * 3 // 4, 100 * 1024 * 1024))


def _pick_row_tile(rows, bytes_per_row, vmem_budget):
    """Largest power-of-two row tile whose double-buffered blocks fit the budget.

    Never returns tiny tiles: if no exact divisor >= 256 exists, rows are padded
    up to a tile multiple instead (a few hundred padded rows are far cheaper
    than thousands of 0.35 us grid steps running below the HBM roofline).
    """
    budget = max(vmem_budget, 4 * 1024 * 1024)
    tile = 256
    for t in (4096, 2048, 1024, 512, 256):
        if 2 * t * bytes_per_row <= budget:
            tile = t
            break
    if rows <= tile:                                 # single grid step
        r = _round_up(max(rows, 8), 8)
        return r, r
    for t in (4096, 2048, 1024, 512, 256):           # prefer an exact divisor
        if t <= tile and rows % t == 0:
            return t, rows
    return tile, _round_up(rows, tile)


# ---------------------------------------------------------------------------
# Kernel 1: tiled per-channel partial batch statistics (sum, sum of squares).
# ---------------------------------------------------------------------------
def _bn_stats_kernel(x_ref, sum_ref, sq_ref):
    x = x_ref[...].astype(jnp.float32)                          # (TR, C)
    sum_ref[...] = jnp.sum(x, axis=0).reshape(1, 1, -1)         # (1, 1, C)
    sq_ref[...] = jnp.sum(x * x, axis=0).reshape(1, 1, -1)


def bn_stats(x2d, vmem_limit):
    """Row-tiled reduction; returns (sum, sum_sq), each shaped (1, C), f32."""
    rows, c = x2d.shape
    tr, r_pad = _pick_row_tile(rows, c * 4, vmem_limit // 2)
    xp = x2d if r_pad == rows else jnp.pad(x2d, ((0, r_pad - rows), (0, 0)))
    nb = r_pad // tr
    psum, psq = pl.pallas_call(
        _bn_stats_kernel,
        grid=(nb,),
        in_specs=[pl.BlockSpec((tr, c), lambda i: (i, 0))],
        out_specs=(pl.BlockSpec((1, 1, c), lambda i: (i, 0, 0)),
                   pl.BlockSpec((1, 1, c), lambda i: (i, 0, 0))),
        out_shape=(jax.ShapeDtypeStruct((nb, 1, c), jnp.float32),
                   jax.ShapeDtypeStruct((nb, 1, c), jnp.float32)),
        compiler_params=pltpu.CompilerParams(
            dimension_semantics=("parallel",),
            vmem_limit_bytes=vmem_limit),
    )(xp)
    return jnp.sum(psum, axis=0), jnp.sum(psq, axis=0)          # (1, C) each


# ---------------------------------------------------------------------------
# Kernel 2: fused BN1-affine + ReLU + 1x1 conv (bf16 MXU matmul, bf16 output)
#           + fused partial BN2 statistics of the conv output (f32 accumulator).
# ---------------------------------------------------------------------------
def _conv1x1_kernel(x_ref, scale_ref, shift_ref, w_ref, o_ref, sum_ref, sq_ref,
                    *, rows, need_mask):
    x = x_ref[...].astype(jnp.float32)                           # (TM, Cin)
    act = jnp.maximum(x * scale_ref[...] + shift_ref[...], 0.0)  # f32 on VPU
    if need_mask:                                                # zero padded rows
        tm = act.shape[0]
        rid = lax.broadcasted_iota(jnp.int32, (tm, 1), 0) + pl.program_id(0) * tm
        act = jnp.where(rid < rows, act, 0.0)
    y = jnp.dot(act.astype(w_ref.dtype), w_ref[...],
                preferred_element_type=jnp.float32)              # (TM, Coutp) f32
    o_ref[...] = y.astype(o_ref.dtype)                           # bf16 store
    # fused partial BN2 statistics (per row block) from the f32 accumulator
    sum_ref[...] = jnp.sum(y, axis=0).reshape(1, 1, -1)
    sq_ref[...] = jnp.sum(y * y, axis=0).reshape(1, 1, -1)


def conv1x1(x2d, scale, shift, w_bf16, vmem_limit):
    rows, cin = x2d.shape
    cout = w_bf16.shape[1]                                       # lane-padded
    bytes_per_row = cin * 4 + cin * 2 + cout * 6                 # in + lhs cast + out/acc
    tm, r_pad = _pick_row_tile(rows, bytes_per_row, vmem_limit // 2)
    xp = x2d if r_pad == rows else jnp.pad(x2d, ((0, r_pad - rows), (0, 0)))
    nb = r_pad // tm
    kern = functools.partial(_conv1x1_kernel, rows=rows,
                             need_mask=(r_pad != rows))
    y, psum, psq = pl.pallas_call(
        kern,
        grid=(nb,),
        in_specs=[pl.BlockSpec((tm, cin), lambda i: (i, 0)),
                  pl.BlockSpec((1, cin), lambda i: (0, 0)),
                  pl.BlockSpec((1, cin), lambda i: (0, 0)),
                  pl.BlockSpec((cin, cout), lambda i: (0, 0))],
        out_specs=(pl.BlockSpec((tm, cout), lambda i: (i, 0)),
                   pl.BlockSpec((1, 1, cout), lambda i: (i, 0, 0)),
                   pl.BlockSpec((1, 1, cout), lambda i: (i, 0, 0))),
        out_shape=(jax.ShapeDtypeStruct((r_pad, cout), MATMUL_DTYPE),
                   jax.ShapeDtypeStruct((nb, 1, cout), jnp.float32),
                   jax.ShapeDtypeStruct((nb, 1, cout), jnp.float32)),
        compiler_params=pltpu.CompilerParams(
            dimension_semantics=("parallel",),
            vmem_limit_bytes=vmem_limit),
    )(xp, scale, shift, w_bf16)
    if r_pad != rows:
        y = y[:rows]
    return y, jnp.sum(psum, axis=0), jnp.sum(psq, axis=0)


# ---------------------------------------------------------------------------
# Kernel 3: fused BN2-affine + ReLU + 3x3 conv (stride 1, pad 1).
# One image per grid step; W-im2col scratch (bf16) + 3 deep-K (3*C) matmuls.
# Outputs only the (lane-padded) new-feature channels; the identity concat is
# done outside, directly in NCHW, so the identity never flows through VMEM.
# ---------------------------------------------------------------------------
def _conv3x3_kernel(y_ref, scale_ref, shift_ref, w_ref, o_ref, pad_ref, col_ref):
    # y_ref:  (1, H, W, C)  bf16     conv1 output (one image), C lane-padded
    # w_ref:  (3, 3*C, Gp)  bf16     3x3 weights with (dw, c) folded into K
    # o_ref:  (1, H, W, Gp) f32      new features only (lane-dense)
    # pad_ref: (H+2, W+2, C) bf16    zero-padded activations
    # col_ref: ((H+2)*W, 3*C) bf16   W-direction im2col
    _, H, W, C = y_ref.shape
    Gp = w_ref.shape[2]
    HW = H * W

    # BN2 affine + ReLU in f32 on the VPU; single cast to bf16.
    act_f32 = jnp.maximum(
        y_ref[0].astype(jnp.float32) * scale_ref[...] + shift_ref[...], 0.0)
    act = act_f32.astype(pad_ref.dtype)                          # (H, W, C)

    # Re-zero only the halo strips each step (cheap; megacore-safe under
    # "parallel" sharding since per-core scratch starts uninitialized).
    zrow = jnp.zeros((1, W + 2, C), pad_ref.dtype)
    zcol = jnp.zeros((H + 2, 1, C), pad_ref.dtype)
    pad_ref[0:1, :, :] = zrow
    pad_ref[H + 1:H + 2, :, :] = zrow
    pad_ref[:, 0:1, :] = zcol
    pad_ref[:, W + 1:W + 2, :] = zcol
    pad_ref[1:H + 1, 1:W + 1, :] = act

    # im2col along W: the dw==1 tap needs no W shift, so it is written straight
    # from the activation (its halo rows zeroed separately); only dw==0 / dw==2
    # are routed through the padded scratch (cuts one full-image copy per step).
    zhalo = jnp.zeros((W, C), col_ref.dtype)
    col_ref[0:W, C:2 * C] = zhalo
    col_ref[(H + 1) * W:(H + 2) * W, C:2 * C] = zhalo
    col_ref[W:W + HW, C:2 * C] = act.reshape(HW, C)
    for dw in (0, 2):
        # col[i*W + w, dw*C + c] = Apad[i, w + dw, c]; dw*C is lane-aligned.
        col_ref[:, dw * C:(dw + 1) * C] = (
            pad_ref[:, dw:dw + W, :].reshape((H + 2) * W, C))

    # 3 matmuls over dh with K = 3*C; accumulator initialized from the first dot.
    # TODO(synk): pad the col row stride W up to a multiple of 16 when W % 16 != 0
    # (bf16 sublane packing) to avoid relayout on the dh-shifted LHS loads.
    acc = jnp.dot(col_ref[0:HW, :], w_ref[0], preferred_element_type=jnp.float32)
    for dh in (1, 2):
        acc = acc + jnp.dot(col_ref[dh * W:dh * W + HW, :], w_ref[dh],
                            preferred_element_type=jnp.float32)

    o_ref[...] = acc.reshape(1, H, W, Gp).astype(o_ref.dtype)


def conv3x3(y4d, scale, shift, w2col, vmem_limit):
    n, h, w, c = y4d.shape
    gp = w2col.shape[2]
    # TODO(synk): for very large images on v7x (64 MiB VMEM) add H-row-block
    # tiling with a 1-row halo (manual DMA window) instead of one image / step;
    # with the identity concat removed and bf16 scratch the per-image footprint
    # fits typical DenseNet shapes, so it is left per-image here.
    return pl.pallas_call(
        _conv3x3_kernel,
        grid=(n,),
        in_specs=[pl.BlockSpec((1, h, w, c), lambda i: (i, 0, 0, 0)),
                  pl.BlockSpec((1, c), lambda i: (0, 0)),
                  pl.BlockSpec((1, c), lambda i: (0, 0)),
                  pl.BlockSpec((3, 3 * c, gp), lambda i: (0, 0, 0))],
        out_specs=pl.BlockSpec((1, h, w, gp), lambda i: (i, 0, 0, 0)),
        out_shape=jax.ShapeDtypeStruct((n, h, w, gp), jnp.float32),
        scratch_shapes=[pltpu.VMEM((h + 2, w + 2, c), MATMUL_DTYPE),
                        pltpu.VMEM(((h + 2) * w, 3 * c), MATMUL_DTYPE)],
        compiler_params=pltpu.CompilerParams(
            dimension_semantics=("parallel",),
            vmem_limit_bytes=vmem_limit),
    )(y4d, scale, shift, w2col)


# ---------------------------------------------------------------------------
# Wrapper: full BottleNeck forward (training-mode BatchNorm, like the spec).
# ---------------------------------------------------------------------------
def bottleneck_forward(x_nchw, params):
    n, cin, h, w = x_nchw.shape
    x = jnp.transpose(x_nchw, (0, 2, 3, 1))                      # NCHW -> NHWC
    rows = n * h * w
    w1 = params["w1"]                                            # (Cin, 4*growth)
    w2 = params["w2"]                                            # (3, 3, 4*g, g)
    c4 = w1.shape[1]
    g = w2.shape[3]
    c4p = _round_up(c4, LANE)                                    # lane-padded
    gp = _round_up(g, LANE)
    vmem = _vmem_limit_bytes()

    # --- BN1 (batch stats via tiled Pallas reduction) ---
    x2d = x.reshape(rows, cin)
    s1, q1 = bn_stats(x2d, vmem)
    mean1 = s1 / rows
    var1 = jnp.maximum(q1 / rows - mean1 * mean1, 0.0)           # biased, clamped
    scale1 = params["gamma1"] / jnp.sqrt(var1 + EPS)
    shift1 = params["beta1"] - mean1 * scale1

    # --- conv1 (1x1): fused BN1 affine + ReLU + partial BN2 stats; bf16 y1 ---
    w1p = jnp.zeros((cin, c4p), MATMUL_DTYPE).at[:, :c4].set(w1.astype(MATMUL_DTYPE))
    y1, s2, q2 = conv1x1(x2d, scale1, shift1, w1p, vmem)         # (rows, c4p) bf16
    mean2 = s2 / rows
    var2 = jnp.maximum(q2 / rows - mean2 * mean2, 0.0)
    # NOTE: BN2 stats come from the bf16-input / f32-accumulate matmul output,
    # a small, accepted approximation of the f32 reference conv.
    gamma2 = jnp.zeros((1, c4p), jnp.float32).at[:, :c4].set(params["gamma2"])
    beta2 = jnp.zeros((1, c4p), jnp.float32).at[:, :c4].set(params["beta2"])
    scale2 = gamma2 / jnp.sqrt(var2 + EPS)
    shift2 = beta2 - mean2 * scale2

    # --- conv2 (3x3, pad 1): fused BN2 affine + ReLU; new features only ---
    w2p = jnp.zeros((3, 3, c4p, gp), MATMUL_DTYPE)
    w2p = w2p.at[:, :, :c4, :g].set(w2.astype(MATMUL_DTYPE))
    w2col = w2p.reshape(3, 3 * c4p, gp)                          # (dw, c) -> K
    y1_4d = y1.reshape(n, h, w, c4p)
    new_nhwc = conv3x3(y1_4d, scale2, shift2, w2col, vmem)       # (n,h,w,gp) f32

    # Concat in NCHW against the untouched identity (identity never transposed).
    new_nchw = jnp.transpose(new_nhwc[..., :g], (0, 3, 1, 2))
    return jnp.concatenate([new_nchw, x_nchw], axis=1)


# ---------------------------------------------------------------------------
# Pure-JAX reference (same math, lax convs) for a sanity check.
# ---------------------------------------------------------------------------
def reference(x_nchw, params):
    def bn(x, gamma, beta):
        mean = jnp.mean(x, axis=(0, 2, 3), keepdims=True)
        var = jnp.mean((x - mean) ** 2, axis=(0, 2, 3), keepdims=True)
        gg = gamma.reshape(1, -1, 1, 1)
        bb = beta.reshape(1, -1, 1, 1)
        return (x - mean) / jnp.sqrt(var + EPS) * gg + bb

    h = jax.nn.relu(bn(x_nchw, params["gamma1"], params["beta1"]))
    w1 = params["w1"].T[:, :, None, None]                        # (C4, Cin, 1, 1)
    h = lax.conv_general_dilated(h, w1, (1, 1), "VALID")
    h2 = jax.nn.relu(bn(h, params["gamma2"], params["beta2"]))
    w2 = jnp.transpose(params["w2"], (3, 2, 0, 1))               # (G, C4, 3, 3)
    h2 = lax.conv_general_dilated(h2, w2, (1, 1), ((1, 1), (1, 1)))
    return jnp.concatenate([h2, x_nchw], axis=1)


if __name__ == "__main__":
    N, in_dims, H, W = 2, 4, 16, 16
    growth_rate = 4
    C4 = 4 * growth_rate

    key = jax.random.PRNGKey(0)
    ks = jax.random.split(key, 7)
    x = jax.random.normal(ks[0], (N, in_dims, H, W), jnp.float32)

    params = {
        "gamma1": 1.0 + 0.1 * jax.random.normal(ks[1], (1, in_dims), jnp.float32),
        "beta1": 0.05 * jax.random.normal(ks[2], (1, in_dims), jnp.float32),
        "w1": jax.random.normal(ks[3], (in_dims, C4), jnp.float32) / jnp.sqrt(in_dims),
        "gamma2": 1.0 + 0.1 * jax.random.normal(ks[4], (1, C4), jnp.float32),
        "beta2": 0.05 * jax.random.normal(ks[5], (1, C4), jnp.float32),
        "w2": jax.random.normal(ks[6], (3, 3, C4, growth_rate), jnp.float32)
              / jnp.sqrt(9 * C4),
    }

    out = bottleneck_forward(x, params)
    out = jax.block_until_ready(out)
    assert out.shape == (N, growth_rate + in_dims, H, W), out.shape

    ref = jax.block_until_ready(reference(x, params))
    # bf16 MXU inputs + bf16 y1 storage (f32 accumulation) -> loose tolerance.
    assert jnp.allclose(out, ref, rtol=3e-2, atol=3e-2), float(
        jnp.max(jnp.abs(out - ref)))

    print("KERNEL_OK")
</pallas_src>

<mosaic_0001>
module attributes {stable_mosaic.version = 11 : i64} {
  func.func @_bn_stats_kernel(%arg0: i32, %arg1: memref<512x4xf32, #tpu.memory_space<vmem>>, %arg2: memref<1x1x4xf32, #tpu.memory_space<vmem>>, %arg3: memref<1x1x4xf32, #tpu.memory_space<vmem>>) attributes {dimension_semantics = [#tpu.dimension_semantics<parallel>], iteration_bounds = array<i64: 1>, scalar_prefetch = 0 : i64, scratch_operands = 0 : i64, tpu.core_type = #tpu.core_type<tc>, window_params = [{transform_indices = @transform_0, window_bounds = array<i64: 512, 4>}, {transform_indices = @transform_1, window_bounds = array<i64: 1, 1, 4>}, {transform_indices = @transform_2, window_bounds = array<i64: 1, 1, 4>}]} {
    %c0 = arith.constant 0 : index
    %c0_0 = arith.constant 0 : index
    %0 = vector.load %arg1[%c0, %c0_0] : memref<512x4xf32, #tpu.memory_space<vmem>>, vector<512x4xf32>
    %cst = arith.constant dense<0.000000e+00> : vector<4xf32>
    %1 = vector.multi_reduction <add>, %0, %cst [0] : vector<512x4xf32> to vector<4xf32>
    %2 = vector.shape_cast %1 : vector<4xf32> to vector<1x1x4xf32>
    %c0_1 = arith.constant 0 : index
    %c0_2 = arith.constant 0 : index
    %c0_3 = arith.constant 0 : index
    %3 = vector.load %arg2[%c0_1, %c0_2, %c0_3] : memref<1x1x4xf32, #tpu.memory_space<vmem>>, vector<1x1x4xf32>
    tpu.vector_store %arg2[%c0_1, %c0_2, %c0_3], %2 {strides = array<i32>} : memref<1x1x4xf32, #tpu.memory_space<vmem>>, vector<1x1x4xf32>,
    %4 = arith.mulf %0, %0 : vector<512x4xf32>
    %cst_4 = arith.constant dense<0.000000e+00> : vector<4xf32>
    %5 = vector.multi_reduction <add>, %4, %cst_4 [0] : vector<512x4xf32> to vector<4xf32>
    %6 = vector.shape_cast %5 : vector<4xf32> to vector<1x1x4xf32>
    %c0_5 = arith.constant 0 : index
    %c0_6 = arith.constant 0 : index
    %c0_7 = arith.constant 0 : index
    %7 = vector.load %arg3[%c0_5, %c0_6, %c0_7] : memref<1x1x4xf32, #tpu.memory_space<vmem>>, vector<1x1x4xf32>
    tpu.vector_store %arg3[%c0_5, %c0_6, %c0_7], %6 {strides = array<i32>} : memref<1x1x4xf32, #tpu.memory_space<vmem>>, vector<1x1x4xf32>,
    return
  }
  func.func @transform_0(%arg0: i32) -> (i32, i32) {
    %c0_i32 = arith.constant 0 : i32
    %c0_i32_0 = arith.constant 0 : i32
    return %arg0, %c0_i32 : i32, i32
  }
  func.func @transform_1(%arg0: i32) -> (i32, i32, i32) {
    %c0_i32 = arith.constant 0 : i32
    %c0_i32_0 = arith.constant 0 : i32
    %c0_i32_1 = arith.constant 0 : i32
    return %arg0, %c0_i32, %c0_i32_0 : i32, i32, i32
  }
  func.func @transform_2(%arg0: i32) -> (i32, i32, i32) {
    %c0_i32 = arith.constant 0 : i32
    %c0_i32_0 = arith.constant 0 : i32
    %c0_i32_1 = arith.constant 0 : i32
    return %arg0, %c0_i32, %c0_i32_0 : i32, i32, i32
  }
}

</mosaic_0001>

<bundles_post_ra>
// kernel: tpu_custom_call.1
= control target key start
LH: loop header
LB: loop body
LE: loop exit
PB: predicated region body
PF: predicated region fallthrough
CT: control target
= control target key end

     0   :  { %8 = vsyncpa [#allocation3], 0  ;;  %s841_s0 = inlined_call_operand.vmem [shape: f32[512,4], index: 0, kind: input, shape index: {}]   ;;  %s842_s1 = inlined_call_operand.hbm [shape: f32[1,1,4], index: 1, kind: output, shape index: {0}]   ;;  %s843_s2 = inlined_call_operand.hbm [shape: f32[1,1,4], index: 2, kind: output, shape index: {1}]  }
   0x1   :  { %9 = vsyncpa [#allocation5], 0  ;;  %v12_v0 = vld [vmem:[%s841_s0] sm:$0xff]  ;;  %v13_v1 = vld [vmem:[%s841_s0 + $0x8] sm:$0xff]  ;;  %vm76_vm0 = vcmask 31744   ;;  %s417_s28 = sshll.u32 %s842_s1, 4  ;;  %s418_s28 = int_to_ptr.hbm [resolvable:$true] %s417_s28 }
   0x2   :  { %v14_v2 = vld [vmem:[%s841_s0 + $0x10] sm:$0xff]  ;;  %v77_v3 = vsel %vm76_vm0, %v12_v0, 0.0  ;;  %v78_v4 = vsel %vm76_vm0, %v13_v1, 0.0  ;;  %v15_v5 = vld [vmem:[%s841_s0 + $0x18] sm:$0xff]  ;;  %v16_v9 = vld [vmem:[%s841_s0 + $0x20] sm:$0xff]  ;;  %v212_v21 = vmul.f32 %v12_v0, %v12_v0  ;;  %v213_v22 = vmul.f32 %v13_v1, %v13_v1  ;;  %s497_s29 = smov [#allocation4]  }
   0x3   :  { %v79_v6 = vadd.f32 %v78_v4, %v77_v3  ;;  %v80_v7 = vsel %vm76_vm0, %v14_v2, 0.0  ;;  %v82_v8 = vsel %vm76_vm0, %v15_v5, 0.0  ;;  %v84_v11 = vsel %vm76_vm0, %v16_v9, 0.0  ;;  %v17_v12 = vld [vmem:[%s841_s0 + $0x28] sm:$0xff]  ;;  %v18_v15 = vld [vmem:[%s841_s0 + $0x30] sm:$0xff]  ;;  %v19_v18 = vld [vmem:[%s841_s0 + $0x38] sm:$0xff] }
   0x4   :  { %v86_v14 = vsel %vm76_vm0, %v17_v12, 0.0  ;;  %v88_v17 = vsel %vm76_vm0, %v18_v15, 0.0  ;;  %v90_v20 = vsel %vm76_vm0, %v19_v18, 0.0  ;;  %v214_v23 = vmul.f32 %v14_v2, %v14_v2  ;;  %v20_v24 = vld [vmem:[%s841_s0 + $0x40] sm:$0xff]  ;;  %v21_v26 = vld [vmem:[%s841_s0 + $0x48] sm:$0xff]  ;;  %v22_v35 = vld [vmem:[%s841_s0 + $0x50] sm:$0xff] }
   0x5   :  { %v81_v10 = vadd.f32 %v80_v7, %v79_v6  ;;  %v92_v27 = vsel %vm76_vm0, %v20_v24, 0.0  ;;  %v215_v28 = vmul.f32 %v15_v5, %v15_v5  ;;  %v94_v30 = vsel %vm76_vm0, %v21_v26, 0.0  ;;  %v23_v41 = vld [vmem:[%s841_s0 + $0x58] sm:$0xff]  ;;  %v24_v47 = vld [vmem:[%s841_s0 + $0x60] sm:$0xff]  ;;  %v25_v53 = vld [vmem:[%s841_s0 + $0x68] sm:$0xff]  ;;  %s426_s30 = sshll.u32 %s497_s29, 4  ;;  %s427_s30 = int_to_ptr.vmem [resolvable:$true] %s426_s30 }
   0x6   :  { %v216_v31 = vmul.f32 %v16_v9, %v16_v9  ;;  %v276_v32 = vsel %vm76_vm0, %v212_v21, 0.0  ;;  %v277_v33 = vsel %vm76_vm0, %v213_v22, 0.0  ;;  %v279_v34 = vsel %vm76_vm0, %v214_v23, 0.0  ;;  %v26_v59 = vld [vmem:[%s841_s0 + $0x70] sm:$0xff]  ;;  %v27_v1 = vld [vmem:[%s841_s0 + $0x78] sm:$0xff]  ;;  %v28_v7 = vld [vmem:[%s841_s0 + $0x80] sm:$0xff] }
   0x7   :  { %v83_v13 = vadd.f32 %v82_v8, %v81_v10  ;;  %v278_v37 = vadd.f32 %v277_v33, %v276_v32  ;;  %v96_v38 = vsel %vm76_vm0, %v22_v35, 0.0  ;;  %v217_v39 = vmul.f32 %v17_v12, %v17_v12  ;;  %s428_s4 = sshll.u32 %s843_s2, 4  ;;  %s429_s4 = int_to_ptr.hbm [resolvable:$true] %s428_s4 }
   0x8   :  { %v281_v40 = vsel %vm76_vm0, %v215_v28, 0.0  ;;  %v98_v44 = vsel %vm76_vm0, %v23_v41, 0.0  ;;  %v218_v45 = vmul.f32 %v18_v15, %v18_v15  ;;  %v283_v46 = vsel %vm76_vm0, %v216_v31, 0.0  ;;  %v32_v31 = vld [vmem:[%s841_s0 + $0xa0] sm:$0xff] }
   0x9   :  { %v85_v16 = vadd.f32 %v84_v11, %v83_v13  ;;  %v280_v43 = vadd.f32 %v279_v34, %v278_v37  ;;  %v100_v50 = vsel %vm76_vm0, %v24_v47, 0.0  ;;  %v219_v51 = vmul.f32 %v19_v18, %v19_v18  ;;  %v29_v13 = vld [vmem:[%s841_s0 + $0x88] sm:$0xff] }
   0xa   :  { %v285_v52 = vsel %vm76_vm0, %v217_v39, 0.0  ;;  %v102_v56 = vsel %vm76_vm0, %v25_v53, 0.0  ;;  %v220_v57 = vmul.f32 %v20_v24, %v20_v24  ;;  %v287_v58 = vsel %vm76_vm0, %v218_v45, 0.0  ;;  %v33_v37 = vld [vmem:[%s841_s0 + $0xa8] sm:$0xff] }
   0xb   :  { %v87_v19 = vadd.f32 %v86_v14, %v85_v16  ;;  %v282_v49 = vadd.f32 %v281_v40, %v280_v43  ;;  %v104_v62 = vsel %vm76_vm0, %v26_v59, 0.0  ;;  %v221_v63 = vmul.f32 %v21_v26, %v21_v26  ;;  %v34_v43 = vld [vmem:[%s841_s0 + $0xb0] sm:$0xff] }
   0xc   :  { %v289_v0 = vsel %vm76_vm0, %v219_v51, 0.0  ;;  %v106_v4 = vsel %vm76_vm0, %v27_v1, 0.0  ;;  %v222_v5 = vmul.f32 %v22_v35, %v22_v35  ;;  %v291_v6 = vsel %vm76_vm0, %v220_v57, 0.0 }
   0xd   :  { %v89_v25 = vadd.f32 %v88_v17, %v87_v19  ;;  %v284_v55 = vadd.f32 %v283_v46, %v282_v49  ;;  %v108_v10 = vsel %vm76_vm0, %v28_v7, 0.0  ;;  %v223_v11 = vmul.f32 %v23_v41, %v23_v41  ;;  %v30_v19 = vld [vmem:[%s841_s0 + $0x90] sm:$0xff]  ;;  %v35_v49 = vld [vmem:[%s841_s0 + $0xb8] sm:$0xff] }
   0xe   :  { %v293_v12 = vsel %vm76_vm0, %v221_v63, 0.0  ;;  %v110_v16 = vsel %vm76_vm0, %v29_v13, 0.0  ;;  %v224_v17 = vmul.f32 %v24_v47, %v24_v47  ;;  %v295_v18 = vsel %vm76_vm0, %v222_v5, 0.0 }
   0xf   :  { %v91_v29 = vadd.f32 %v90_v20, %v89_v25  ;;  %v286_v61 = vadd.f32 %v285_v52, %v284_v55  ;;  %v112_v22 = vsel %vm76_vm0, %v30_v19, 0.0  ;;  %v225_v23 = vmul.f32 %v25_v53, %v25_v53  ;;  %v31_v25 = vld [vmem:[%s841_s0 + $0x98] sm:$0xff]  ;;  %v36_v55 = vld [vmem:[%s841_s0 + $0xc0] sm:$0xff] }
  0x10   :  { %v297_v24 = vsel %vm76_vm0, %v223_v11, 0.0  ;;  %v114_v28 = vsel %vm76_vm0, %v31_v25, 0.0  ;;  %v116_v34 = vsel %vm76_vm0, %v32_v31, 0.0  ;;  %v227_v35 = vmul.f32 %v27_v1, %v27_v1 }
  0x11   :  { %v93_v36 = vadd.f32 %v92_v27, %v91_v29  ;;  %v288_v3 = vadd.f32 %v287_v58, %v286_v61  ;;  %v226_v29 = vmul.f32 %v26_v59, %v26_v59  ;;  %v118_v40 = vsel %vm76_vm0, %v33_v37, 0.0  ;;  %v37_v61 = vld [vmem:[%s841_s0 + $0xc8] sm:$0xff] }
  0x12   :  { %v228_v41 = vmul.f32 %v28_v7, %v28_v7  ;;  %v120_v46 = vsel %vm76_vm0, %v34_v43, 0.0  ;;  %v229_v47 = vmul.f32 %v29_v13, %v29_v13  ;;  %v122_v52 = vsel %vm76_vm0, %v35_v49, 0.0 }
  0x13   :  { %v95_v42 = vadd.f32 %v94_v30, %v93_v36  ;;  %v290_v9 = vadd.f32 %v289_v0, %v288_v3  ;;  %v299_v30 = vsel %vm76_vm0, %v224_v17, 0.0  ;;  %v301_v36 = vsel %vm76_vm0, %v225_v23, 0.0  ;;  %v38_v3 = vld [vmem:[%s841_s0 + $0xd0] sm:$0xff] }
  0x14   :  { %v230_v53 = vmul.f32 %v30_v19, %v30_v19  ;;  %v124_v58 = vsel %vm76_vm0, %v36_v55, 0.0  ;;  %v231_v59 = vmul.f32 %v31_v25, %v31_v25  ;;  %v126_v0 = vsel %vm76_vm0, %v37_v61, 0.0 }
  0x15   :  { %v97_v48 = vadd.f32 %v96_v38, %v95_v42  ;;  %v292_v15 = vadd.f32 %v291_v6, %v290_v9  ;;  %v303_v42 = vsel %vm76_vm0, %v226_v29, 0.0  ;;  %v232_v1 = vmul.f32 %v32_v31, %v32_v31  ;;  %v39_v9 = vld [vmem:[%s841_s0 + $0xd8] sm:$0xff] }
  0x16   :  { %v128_v6 = vsel %vm76_vm0, %v38_v3, 0.0  ;;  %v233_v7 = vmul.f32 %v33_v37, %v33_v37  ;;  %v234_v13 = vmul.f32 %v34_v43, %v34_v43  ;;  %v235_v19 = vmul.f32 %v35_v49, %v35_v49 }
  0x17   :  { %v99_v54 = vadd.f32 %v98_v44, %v97_v48  ;;  %v294_v21 = vadd.f32 %v293_v12, %v292_v15  ;;  %v305_v48 = vsel %vm76_vm0, %v227_v35, 0.0  ;;  %v130_v12 = vsel %vm76_vm0, %v39_v9, 0.0  ;;  %v40_v15 = vld [vmem:[%s841_s0 + $0xe0] sm:$0xff] }
  0x18   :  { %v236_v25 = vmul.f32 %v36_v55, %v36_v55  ;;  %v237_v31 = vmul.f32 %v37_v61, %v37_v61  ;;  %v238_v37 = vmul.f32 %v38_v3, %v38_v3  ;;  %v239_v43 = vmul.f32 %v39_v9, %v39_v9 }
  0x19   :  { %v101_v60 = vadd.f32 %v100_v50, %v99_v54  ;;  %v296_v27 = vadd.f32 %v295_v18, %v294_v21  ;;  %v307_v54 = vsel %vm76_vm0, %v228_v41, 0.0  ;;  %v132_v18 = vsel %vm76_vm0, %v40_v15, 0.0  ;;  %v41_v21 = vld [vmem:[%s841_s0 + $0xe8] sm:$0xff] }
  0x1a   :  { %v240_v49 = vmul.f32 %v40_v15, %v40_v15  ;;  %v241_v55 = vmul.f32 %v41_v21, %v41_v21  ;;  %vm210_vm1 = vcmask 24576  }
  0x1b   :  { %v103_v2 = vadd.f32 %v102_v56, %v101_v60  ;;  %v298_v33 = vadd.f32 %v297_v24, %v296_v27  ;;  %v309_v60 = vsel %vm76_vm0, %v229_v47, 0.0  ;;  %v134_v24 = vsel %vm76_vm0, %v41_v21, 0.0  ;;  %v42_v27 = vld [vmem:[%s841_s0 + $0xf0] sm:$0xff] }
  0x1c   :  { %v242_v61 = vmul.f32 %v42_v27, %v42_v27 }
  0x1d   :  { %v105_v8 = vadd.f32 %v104_v62, %v103_v2  ;;  %v300_v39 = vadd.f32 %v299_v30, %v298_v33  ;;  %v311_v2 = vsel %vm76_vm0, %v230_v53, 0.0  ;;  %v136_v30 = vsel %vm76_vm0, %v42_v27, 0.0  ;;  %v43_v33 = vld [vmem:[%s841_s0 + $0xf8] sm:$0xff] }
  0x1e   :  { %v243_v3 = vmul.f32 %v43_v33, %v43_v33 }
  0x1f   :  { %v107_v14 = vadd.f32 %v106_v4, %v105_v8  ;;  %v302_v45 = vadd.f32 %v301_v36, %v300_v39  ;;  %v313_v8 = vsel %vm76_vm0, %v231_v59, 0.0  ;;  %v138_v36 = vsel %vm76_vm0, %v43_v33, 0.0  ;;  %v44_v39 = vld [vmem:[%s841_s0 + $0x100] sm:$0xff] }
  0x20   :  { %v244_v9 = vmul.f32 %v44_v39, %v44_v39 }
  0x21   :  { %v109_v20 = vadd.f32 %v108_v10, %v107_v14  ;;  %v304_v51 = vadd.f32 %v303_v42, %v302_v45  ;;  %v315_v14 = vsel %vm76_vm0, %v232_v1, 0.0  ;;  %v140_v42 = vsel %vm76_vm0, %v44_v39, 0.0  ;;  %v45_v45 = vld [vmem:[%s841_s0 + $0x108] sm:$0xff] }
  0x22   :  { %v245_v15 = vmul.f32 %v45_v45, %v45_v45 }
  0x23   :  { %v111_v26 = vadd.f32 %v110_v16, %v109_v20  ;;  %v306_v57 = vadd.f32 %v305_v48, %v304_v51  ;;  %v317_v20 = vsel %vm76_vm0, %v233_v7, 0.0  ;;  %v142_v48 = vsel %vm76_vm0, %v45_v45, 0.0  ;;  %v46_v51 = vld [vmem:[%s841_s0 + $0x110] sm:$0xff] }
  0x24   :  { %v246_v21 = vmul.f32 %v46_v51, %v46_v51 }
  0x25   :  { %v113_v32 = vadd.f32 %v112_v22, %v111_v26  ;;  %v308_v63 = vadd.f32 %v307_v54, %v306_v57  ;;  %v319_v26 = vsel %vm76_vm0, %v234_v13, 0.0  ;;  %v144_v54 = vsel %vm76_vm0, %v46_v51, 0.0  ;;  %v47_v57 = vld [vmem:[%s841_s0 + $0x118] sm:$0xff] }
  0x26   :  { %v247_v27 = vmul.f32 %v47_v57, %v47_v57 }
  0x27   :  { %v115_v38 = vadd.f32 %v114_v28, %v113_v32  ;;  %v310_v5 = vadd.f32 %v309_v60, %v308_v63  ;;  %v321_v32 = vsel %vm76_vm0, %v235_v19, 0.0  ;;  %v146_v60 = vsel %vm76_vm0, %v47_v57, 0.0  ;;  %v48_v63 = vld [vmem:[%s841_s0 + $0x120] sm:$0xff] }
  0x28   :  { %v248_v33 = vmul.f32 %v48_v63, %v48_v63 }
  0x29   :  { %v117_v44 = vadd.f32 %v116_v34, %v115_v38  ;;  %v312_v11 = vadd.f32 %v311_v2, %v310_v5  ;;  %v323_v38 = vsel %vm76_vm0, %v236_v25, 0.0  ;;  %v148_v2 = vsel %vm76_vm0, %v48_v63, 0.0  ;;  %v49_v5 = vld [vmem:[%s841_s0 + $0x128] sm:$0xff] }
  0x2a   :  { %v249_v39 = vmul.f32 %v49_v5, %v49_v5 }
  0x2b   :  { %v119_v50 = vadd.f32 %v118_v40, %v117_v44  ;;  %v314_v17 = vadd.f32 %v313_v8, %v312_v11  ;;  %v325_v44 = vsel %vm76_vm0, %v237_v31, 0.0  ;;  %v150_v8 = vsel %vm76_vm0, %v49_v5, 0.0  ;;  %v50_v11 = vld [vmem:[%s841_s0 + $0x130] sm:$0xff] }
  0x2c   :  { %v250_v45 = vmul.f32 %v50_v11, %v50_v11 }
  0x2d   :  { %v121_v56 = vadd.f32 %v120_v46, %v119_v50  ;;  %v316_v23 = vadd.f32 %v315_v14, %v314_v17  ;;  %v327_v50 = vsel %vm76_vm0, %v238_v37, 0.0  ;;  %v152_v14 = vsel %vm76_vm0, %v50_v11, 0.0  ;;  %v51_v17 = vld [vmem:[%s841_s0 + $0x138] sm:$0xff] }
  0x2e   :  { %v251_v51 = vmul.f32 %v51_v17, %v51_v17 }
  0x2f   :  { %v123_v62 = vadd.f32 %v122_v52, %v121_v56  ;;  %v318_v29 = vadd.f32 %v317_v20, %v316_v23  ;;  %v329_v56 = vsel %vm76_vm0, %v239_v43, 0.0  ;;  %v154_v20 = vsel %vm76_vm0, %v51_v17, 0.0  ;;  %v52_v23 = vld [vmem:[%s841_s0 + $0x140] sm:$0xff] }
  0x30   :  { %v252_v57 = vmul.f32 %v52_v23, %v52_v23 }
  0x31   :  { %v125_v4 = vadd.f32 %v124_v58, %v123_v62  ;;  %v320_v35 = vadd.f32 %v319_v26, %v318_v29  ;;  %v331_v62 = vsel %vm76_vm0, %v240_v49, 0.0  ;;  %v156_v26 = vsel %vm76_vm0, %v52_v23, 0.0  ;;  %v53_v29 = vld [vmem:[%s841_s0 + $0x148] sm:$0xff] }
  0x32   :  { %v253_v63 = vmul.f32 %v53_v29, %v53_v29 }
  0x33   :  { %v127_v10 = vadd.f32 %v126_v0, %v125_v4  ;;  %v322_v41 = vadd.f32 %v321_v32, %v320_v35  ;;  %v333_v4 = vsel %vm76_vm0, %v241_v55, 0.0  ;;  %v158_v32 = vsel %vm76_vm0, %v53_v29, 0.0  ;;  %v54_v35 = vld [vmem:[%s841_s0 + $0x150] sm:$0xff] }
  0x34   :  { %v254_v5 = vmul.f32 %v54_v35, %v54_v35 }
  0x35   :  { %v129_v16 = vadd.f32 %v128_v6, %v127_v10  ;;  %v324_v47 = vadd.f32 %v323_v38, %v322_v41  ;;  %v335_v10 = vsel %vm76_vm0, %v242_v61, 0.0  ;;  %v160_v38 = vsel %vm76_vm0, %v54_v35, 0.0  ;;  %v55_v41 = vld [vmem:[%s841_s0 + $0x158] sm:$0xff] }
  0x36   :  { %v255_v11 = vmul.f32 %v55_v41, %v55_v41 }
  0x37   :  { %v131_v22 = vadd.f32 %v130_v12, %v129_v16  ;;  %v326_v53 = vadd.f32 %v325_v44, %v324_v47  ;;  %v337_v16 = vsel %vm76_vm0, %v243_v3, 0.0  ;;  %v162_v44 = vsel %vm76_vm0, %v55_v41, 0.0  ;;  %v56_v47 = vld [vmem:[%s841_s0 + $0x160] sm:$0xff] }
  0x38   :  { %v256_v17 = vmul.f32 %v56_v47, %v56_v47 }
  0x39   :  { %v133_v28 = vadd.f32 %v132_v18, %v131_v22  ;;  %v328_v59 = vadd.f32 %v327_v50, %v326_v53  ;;  %v339_v22 = vsel %vm76_vm0, %v244_v9, 0.0  ;;  %v164_v50 = vsel %vm76_vm0, %v56_v47, 0.0  ;;  %v57_v53 = vld [vmem:[%s841_s0 + $0x168] sm:$0xff] }
  0x3a   :  { %v257_v23 = vmul.f32 %v57_v53, %v57_v53 }
  0x3b   :  { %v135_v34 = vadd.f32 %v134_v24, %v133_v28  ;;  %v330_v1 = vadd.f32 %v329_v56, %v328_v59  ;;  %v341_v28 = vsel %vm76_vm0, %v245_v15, 0.0  ;;  %v166_v56 = vsel %vm76_vm0, %v57_v53, 0.0  ;;  %v58_v59 = vld [vmem:[%s841_s0 + $0x170] sm:$0xff] }
  0x3c   :  { %v258_v29 = vmul.f32 %v58_v59, %v58_v59 }
  0x3d   :  { %v137_v40 = vadd.f32 %v136_v30, %v135_v34  ;;  %v332_v7 = vadd.f32 %v331_v62, %v330_v1  ;;  %v343_v34 = vsel %vm76_vm0, %v246_v21, 0.0  ;;  %v168_v62 = vsel %vm76_vm0, %v58_v59, 0.0  ;;  %v59_v1 = vld [vmem:[%s841_s0 + $0x178] sm:$0xff] }
  0x3e   :  { %v259_v35 = vmul.f32 %v59_v1, %v59_v1 }
  0x3f   :  { %v139_v46 = vadd.f32 %v138_v36, %v137_v40  ;;  %v334_v13 = vadd.f32 %v333_v4, %v332_v7  ;;  %v345_v40 = vsel %vm76_vm0, %v247_v27, 0.0  ;;  %v170_v4 = vsel %vm76_vm0, %v59_v1, 0.0  ;;  %v60_v7 = vld [vmem:[%s841_s0 + $0x180] sm:$0xff] }
  0x40   :  { %v260_v41 = vmul.f32 %v60_v7, %v60_v7 }
  0x41   :  { %v141_v52 = vadd.f32 %v140_v42, %v139_v46  ;;  %v336_v19 = vadd.f32 %v335_v10, %v334_v13  ;;  %v347_v46 = vsel %vm76_vm0, %v248_v33, 0.0  ;;  %v172_v10 = vsel %vm76_vm0, %v60_v7, 0.0  ;;  %v61_v13 = vld [vmem:[%s841_s0 + $0x188] sm:$0xff] }
  0x42   :  { %v261_v47 = vmul.f32 %v61_v13, %v61_v13 }
  0x43   :  { %v143_v58 = vadd.f32 %v142_v48, %v141_v52  ;;  %v338_v25 = vadd.f32 %v337_v16, %v336_v19  ;;  %v349_v52 = vsel %vm76_vm0, %v249_v39, 0.0  ;;  %v174_v16 = vsel %vm76_vm0, %v61_v13, 0.0  ;;  %v62_v19 = vld [vmem:[%s841_s0 + $0x190] sm:$0xff] }
  0x44   :  { %v262_v53 = vmul.f32 %v62_v19, %v62_v19 }
  0x45   :  { %v145_v0 = vadd.f32 %v144_v54, %v143_v58  ;;  %v340_v31 = vadd.f32 %v339_v22, %v338_v25  ;;  %v351_v58 = vsel %vm76_vm0, %v250_v45, 0.0  ;;  %v176_v22 = vsel %vm76_vm0, %v62_v19, 0.0  ;;  %v63_v25 = vld [vmem:[%s841_s0 + $0x198] sm:$0xff] }
  0x46   :  { %v263_v59 = vmul.f32 %v63_v25, %v63_v25 }
  0x47   :  { %v147_v6 = vadd.f32 %v146_v60, %v145_v0  ;;  %v342_v37 = vadd.f32 %v341_v28, %v340_v31  ;;  %v353_v0 = vsel %vm76_vm0, %v251_v51, 0.0  ;;  %v178_v28 = vsel %vm76_vm0, %v63_v25, 0.0  ;;  %v64_v31 = vld [vmem:[%s841_s0 + $0x1a0] sm:$0xff] }
  0x48   :  { %v264_v1 = vmul.f32 %v64_v31, %v64_v31 }
  0x49   :  { %v149_v12 = vadd.f32 %v148_v2, %v147_v6  ;;  %v344_v43 = vadd.f32 %v343_v34, %v342_v37  ;;  %v355_v6 = vsel %vm76_vm0, %v252_v57, 0.0  ;;  %v180_v34 = vsel %vm76_vm0, %v64_v31, 0.0  ;;  %v65_v37 = vld [vmem:[%s841_s0 + $0x1a8] sm:$0xff] }
  0x4a   :  { %v265_v7 = vmul.f32 %v65_v37, %v65_v37 }
  0x4b   :  { %v151_v18 = vadd.f32 %v150_v8, %v149_v12  ;;  %v346_v49 = vadd.f32 %v345_v40, %v344_v43  ;;  %v357_v12 = vsel %vm76_vm0, %v253_v63, 0.0  ;;  %v182_v40 = vsel %vm76_vm0, %v65_v37, 0.0  ;;  %v66_v43 = vld [vmem:[%s841_s0 + $0x1b0] sm:$0xff] }
  0x4c   :  { %v266_v13 = vmul.f32 %v66_v43, %v66_v43 }
  0x4d   :  { %v153_v24 = vadd.f32 %v152_v14, %v151_v18  ;;  %v348_v55 = vadd.f32 %v347_v46, %v346_v49  ;;  %v359_v18 = vsel %vm76_vm0, %v254_v5, 0.0  ;;  %v184_v46 = vsel %vm76_vm0, %v66_v43, 0.0  ;;  %v67_v49 = vld [vmem:[%s841_s0 + $0x1b8] sm:$0xff] }
  0x4e   :  { %v267_v19 = vmul.f32 %v67_v49, %v67_v49 }
  0x4f   :  { %v155_v30 = vadd.f32 %v154_v20, %v153_v24  ;;  %v350_v61 = vadd.f32 %v349_v52, %v348_v55  ;;  %v361_v24 = vsel %vm76_vm0, %v255_v11, 0.0  ;;  %v186_v52 = vsel %vm76_vm0, %v67_v49, 0.0  ;;  %v68_v55 = vld [vmem:[%s841_s0 + $0x1c0] sm:$0xff] }
  0x50   :  { %v268_v25 = vmul.f32 %v68_v55, %v68_v55 }
  0x51   :  { %v157_v36 = vadd.f32 %v156_v26, %v155_v30  ;;  %v352_v3 = vadd.f32 %v351_v58, %v350_v61  ;;  %v363_v30 = vsel %vm76_vm0, %v256_v17, 0.0  ;;  %v188_v58 = vsel %vm76_vm0, %v68_v55, 0.0  ;;  %v69_v61 = vld [vmem:[%s841_s0 + $0x1c8] sm:$0xff] }
  0x52   :  { %v269_v31 = vmul.f32 %v69_v61, %v69_v61 }
  0x53   :  { %v159_v42 = vadd.f32 %v158_v32, %v157_v36  ;;  %v354_v9 = vadd.f32 %v353_v0, %v352_v3  ;;  %v365_v36 = vsel %vm76_vm0, %v257_v23, 0.0  ;;  %v190_v0 = vsel %vm76_vm0, %v69_v61, 0.0  ;;  %v70_v3 = vld [vmem:[%s841_s0 + $0x1d0] sm:$0xff] }
  0x54   :  { %v270_v37 = vmul.f32 %v70_v3, %v70_v3 }
  0x55   :  { %v161_v48 = vadd.f32 %v160_v38, %v159_v42  ;;  %v356_v15 = vadd.f32 %v355_v6, %v354_v9  ;;  %v367_v42 = vsel %vm76_vm0, %v258_v29, 0.0  ;;  %v192_v6 = vsel %vm76_vm0, %v70_v3, 0.0  ;;  %v71_v9 = vld [vmem:[%s841_s0 + $0x1d8] sm:$0xff] }
  0x57   :  { %v163_v54 = vadd.f32 %v162_v44, %v161_v48  ;;  %v358_v21 = vadd.f32 %v357_v12, %v356_v15  ;;  %v369_v48 = vsel %vm76_vm0, %v259_v35, 0.0  ;;  %v194_v12 = vsel %vm76_vm0, %v71_v9, 0.0  ;;  %v72_v15 = vld [vmem:[%s841_s0 + $0x1e0] sm:$0xff] }
  0x59   :  { %v165_v60 = vadd.f32 %v164_v50, %v163_v54  ;;  %v360_v27 = vadd.f32 %v359_v18, %v358_v21  ;;  %v371_v54 = vsel %vm76_vm0, %v260_v41, 0.0  ;;  %v196_v18 = vsel %vm76_vm0, %v72_v15, 0.0  ;;  %v73_v21 = vld [vmem:[%s841_s0 + $0x1e8] sm:$0xff] }
  0x5a   :  { %v271_v41 = vmul.f32 %v71_v9, %v71_v9  ;;  %v273_v49 = vmul.f32 %v73_v21, %v73_v21 }
  0x5b   :  { %v167_v2 = vadd.f32 %v166_v56, %v165_v60  ;;  %v362_v33 = vadd.f32 %v361_v24, %v360_v27  ;;  %v373_v60 = vsel %vm76_vm0, %v261_v47, 0.0  ;;  %v198_v24 = vsel %vm76_vm0, %v73_v21, 0.0  ;;  %v74_v27 = vld [vmem:[%s841_s0 + $0x1f0] sm:$0xff] }
  0x5d   :  { %v169_v8 = vadd.f32 %v168_v62, %v167_v2  ;;  %v364_v39 = vadd.f32 %v363_v30, %v362_v33  ;;  %v375_v2 = vsel %vm76_vm0, %v262_v53, 0.0  ;;  %v200_v30 = vsel %vm76_vm0, %v74_v27, 0.0  ;;  %v75_v33 = vld [vmem:[%s841_s0 + $0x1f8] sm:$0xff]  ;;  %s496_s0 = smov [#allocation2]  }
  0x5e   :  { %v274_v53 = vmul.f32 %v74_v27, %v74_v27  ;;  %s415_s25 = sshll.u32 %s496_s0, 4  ;;  %s416_s25 = int_to_ptr.vmem [resolvable:$true] %s415_s25 }
  0x5f   :  { %v171_v14 = vadd.f32 %v170_v4, %v169_v8  ;;  %v366_v45 = vadd.f32 %v365_v36, %v364_v39  ;;  %v377_v8 = vsel %vm76_vm0, %v263_v59, 0.0  ;;  %v202_v36 = vsel %vm76_vm0, %v75_v33, 0.0 }
  0x60   :  { %v399_v61 = vsel %vm76_vm0, %v274_v53, 0.0 }
  0x61   :  { %v173_v20 = vadd.f32 %v172_v10, %v171_v14  ;;  %v368_v51 = vadd.f32 %v367_v42, %v366_v45  ;;  %v379_v14 = vsel %vm76_vm0, %v264_v1, 0.0  ;;  %v389_v42 = vsel %vm76_vm0, %v269_v31, 0.0 }
  0x62   :  { %v272_v45 = vmul.f32 %v72_v15, %v72_v15 }
  0x63   :  { %v175_v26 = vadd.f32 %v174_v16, %v173_v20  ;;  %v370_v57 = vadd.f32 %v369_v48, %v368_v51  ;;  %v381_v20 = vsel %vm76_vm0, %v265_v7, 0.0 }
  0x65   :  { %v177_v32 = vadd.f32 %v176_v22, %v175_v26  ;;  %v372_v63 = vadd.f32 %v371_v54, %v370_v57  ;;  %v383_v26 = vsel %vm76_vm0, %v266_v13, 0.0  ;;  %v395_v54 = vsel %vm76_vm0, %v272_v45, 0.0 }
  0x66   :  { %v275_v57 = vmul.f32 %v75_v33, %v75_v33 }
  0x67   :  { %v179_v38 = vadd.f32 %v178_v28, %v177_v32  ;;  %v374_v5 = vadd.f32 %v373_v60, %v372_v63  ;;  %v385_v32 = vsel %vm76_vm0, %v267_v19, 0.0 }
  0x69   :  { %v181_v44 = vadd.f32 %v180_v34, %v179_v38  ;;  %v376_v11 = vadd.f32 %v375_v2, %v374_v5  ;;  %v387_v38 = vsel %vm76_vm0, %v268_v25, 0.0 }
  0x6b   :  { %v183_v50 = vadd.f32 %v182_v40, %v181_v44  ;;  %v378_v17 = vadd.f32 %v377_v8, %v376_v11 }
  0x6d   :  { %v185_v56 = vadd.f32 %v184_v46, %v183_v50  ;;  %v380_v23 = vadd.f32 %v379_v14, %v378_v17  ;;  %v391_v46 = vsel %vm76_vm0, %v270_v37, 0.0  ;;  %v393_v50 = vsel %vm76_vm0, %v271_v41, 0.0 }
  0x6f   :  { %v187_v62 = vadd.f32 %v186_v52, %v185_v56  ;;  %v382_v29 = vadd.f32 %v381_v20, %v380_v23 }
  0x71   :  { %v189_v4 = vadd.f32 %v188_v58, %v187_v62  ;;  %v384_v35 = vadd.f32 %v383_v26, %v382_v29  ;;  %v397_v58 = vsel %vm76_vm0, %v273_v49, 0.0 }
  0x73   :  { %v191_v10 = vadd.f32 %v190_v0, %v189_v4  ;;  %v386_v40 = vadd.f32 %v385_v32, %v384_v35  ;;  %v401_v0 = vsel %vm76_vm0, %v275_v57, 0.0 }
  0x75   :  { %v193_v16 = vadd.f32 %v192_v6, %v191_v10  ;;  %v388_v44 = vadd.f32 %v387_v38, %v386_v40 }
  0x77   :  { %v195_v22 = vadd.f32 %v194_v12, %v193_v16  ;;  %v390_v48 = vadd.f32 %v389_v42, %v388_v44 }
  0x79   :  { %v197_v28 = vadd.f32 %v196_v18, %v195_v22  ;;  %v392_v52 = vadd.f32 %v391_v46, %v390_v48 }
  0x7b   :  { %v199_v34 = vadd.f32 %v198_v24, %v197_v28  ;;  %v394_v56 = vadd.f32 %v393_v50, %v392_v52 }
  0x7d   :  { %v201_v39 = vadd.f32 %v200_v30, %v199_v34  ;;  %v396_v60 = vadd.f32 %v395_v54, %v394_v56 }
  0x7f   :  { %v203_v43 = vadd.f32 %v202_v36, %v201_v39  ;;  %v398_v63 = vadd.f32 %v397_v58, %v396_v60 }
  0x81   :  { %v204_v47 = vrot.slane %v203_v43, 4  ;;  %v400_v2 = vadd.f32 %v399_v61, %v398_v63 }
  0x83   :  { %v205_v51 = vadd.f32 %v204_v47, %v203_v43  ;;  %v402_v3 = vadd.f32 %v401_v0, %v400_v2 }
  0x85   :  { %v206_v55 = vrot.slane %v205_v51, 2  ;;  %v403_v4 = vrot.slane %v402_v3, 4 }
  0x87   :  { %v207_v59 = vadd.f32 %v206_v55, %v205_v51  ;;  %v404_v5 = vadd.f32 %v403_v4, %v402_v3 }
  0x89   :  { %v208_v62 = vrot.slane %v207_v59, 1  ;;  %v405_v6 = vrot.slane %v404_v5, 2 }
  0x8b   :  { %v209_v1 = vadd.f32 %v208_v62, %v207_v59  ;;  %v406_v7 = vadd.f32 %v405_v6, %v404_v5 }
  0x8d   :  { %211 = vst.msk [vmem:[#allocation2] sm:$0x1] %vm210_vm1, %v209_v1  ;;  %v407_v8 = vrot.slane %v406_v7, 1 }
  0x8e   :  { %420 = dma.vmem_to_hbm [thread:$0]  %s416_s25, 16, %s418_s28, [#allocation3]  }
  0x8f   :  { %v408_v9 = vadd.f32 %v407_v8, %v406_v7 }
  0x91   :  { %409 = vst.msk [vmem:[#allocation4] sm:$0x1] %vm210_vm1, %v408_v9 }
  0x92   :  { %431 = dma.vmem_to_hbm [thread:$0]  %s427_s30, 16, %s429_s4, [#allocation5]  }
  0x93   :  { %492 = dma.done.wait [#allocation3], 16  }
  0x94   :  { %493 = vsyncadd [#allocation3], 4294967280 }
  0x95   :  { %494 = dma.done.wait [#allocation5], 16  }
  0x96   :  { %495 = vsyncadd [#allocation5], 4294967280 }
  0x97   :  { %440 = vsyncpa [#allocation3], 1 }
  0x98   :  { %441 = vsyncpa [#allocation5], 1 }

</bundles_post_ra>
